<compile_context>
chip_gen: v7x
topology: tpu7x:2x2x1
jax: 0.10.0
libtpu: 0.0.40
codegen_flags: <defaults>
</compile_context>

<pallas_src>
import functools
import math

import jax
import jax.numpy as jnp
from jax.experimental import pallas as pl
from jax.experimental.pallas import tpu as pltpu


def _round_up(x, m):
    return (x + m - 1) // m * m


def _pick_tile(dim, pref, align, min_tile):
    """Pick a tile that divides `dim` (preferred) or fall back to padding.

    Returns (tile, padded_dim).  tile == dim (full extent) is always legal for
    the (8,128) constraint; otherwise tile is a multiple of `align` and divides
    padded_dim.  Padding only triggers for awkward, non-aligned shapes.
    """
    if dim <= pref:
        return dim, dim
    t = (pref // align) * align
    while t >= min_tile:
        if dim % t == 0:
            return t, dim
        t -= align
    return pref, _round_up(dim, pref)


# ----------------------- Tiled matmul + bias (MXU) kernel ---------------------
def _matmul_bias_kernel(x_ref, w_ref, b_ref, o_ref, acc_ref):
    k = pl.program_id(2)

    @pl.when(k == 0)
    def _():
        acc_ref[...] = jnp.zeros_like(acc_ref)

    acc_ref[...] += jnp.dot(x_ref[...], w_ref[...],
                            preferred_element_type=jnp.float32)

    @pl.when(k == pl.num_programs(2) - 1)
    def _():
        o_ref[...] = (acc_ref[...]
                      + b_ref[...].astype(jnp.float32)).astype(o_ref.dtype)


def matmul_bias(x, w_t, b, *, out_dtype=None, tm=1024, tn=256, tk=512):
    """x: (N, K); w_t: (K, M) pre-transposed; b: (M,).  Returns (N, M).

    Large tm keeps activations resident so the (K, M) weight streams from HBM
    ~once (instead of N/256 times); tn/tk stay 256/512 multiples for the MXU.
    """
    N, K = x.shape
    Kw, M = w_t.shape
    assert K == Kw
    out_dtype = out_dtype or x.dtype

    tm, Np = _pick_tile(N, tm, 8, 512)      # rows: sublane-aligned
    tn, Mp = _pick_tile(M, tn, 128, 128)    # out cols: lane-aligned
    tk, Kp = _pick_tile(K, tk, 128, 128)    # contraction

    # Padding only triggers for non-128-aligned shapes; init_params stores the
    # weights so that the common path has Np==N, Kp==K, Mp==M (zero HBM copies).
    if (Np, Kp) != (N, K):
        x = jnp.pad(x, ((0, Np - N), (0, Kp - K)))
    if (Kp, Mp) != (K, M):
        w_t = jnp.pad(w_t, ((0, Kp - K), (0, Mp - M)))
    b2 = b.reshape(1, M)
    if Mp != M:
        b2 = jnp.pad(b2, ((0, 0), (0, Mp - M)))

    in_bytes = x.dtype.itemsize
    out_bytes = jnp.dtype(out_dtype).itemsize
    vmem_need = (2 * (tm * tk + tk * tn + tn) * in_bytes     # double-buffered in
                 + 2 * tm * tn * out_bytes                   # double-buffered out
                 + tm * tn * 4)                              # f32 accumulator
    vmem_limit = int(min(max(2 * vmem_need, 32 * 2**20), 64 * 2**20))

    out = pl.pallas_call(
        _matmul_bias_kernel,
        out_shape=jax.ShapeDtypeStruct((Np, Mp), out_dtype),
        grid_spec=pltpu.PrefetchScalarGridSpec(
            num_scalar_prefetch=0,
            grid=(Np // tm, Mp // tn, Kp // tk),
            in_specs=[
                pl.BlockSpec((tm, tk), lambda i, j, k: (i, k)),
                pl.BlockSpec((tk, tn), lambda i, j, k: (k, j)),
                pl.BlockSpec((1, tn), lambda i, j, k: (0, j)),
            ],
            out_specs=pl.BlockSpec((tm, tn), lambda i, j, k: (i, j)),
            scratch_shapes=[pltpu.VMEM((tm, tn), jnp.float32)],
        ),
        compiler_params=pltpu.CompilerParams(
            dimension_semantics=("parallel", "parallel", "arbitrary"),
            vmem_limit_bytes=vmem_limit),
    )(x, w_t, b2)
    if (Np, Mp) != (N, M):
        out = out[:N, :M]
    return out


# --------------------------- LSTM recurrence kernel ---------------------------
def _lstm_recurrence_kernel(gx_ref, whh_hbm, out_ref, h_sc, c_sc, whh_sc,
                            whh_sem, *, unroll):
    s = pl.program_id(0)

    @pl.when(s == 0)
    def _():
        # One-time load of W_hh^T into single-buffered VMEM scratch (stays
        # resident, compute dtype -> bf16 in the production path).  The DMA is
        # started first and waited on only after the h/c zero-init so the
        # fetch overlaps the state initialization.
        cp = pltpu.make_async_copy(whh_hbm, whh_sc, whh_sem)
        cp.start()
        h_sc[...] = jnp.zeros_like(h_sc)
        c_sc[...] = jnp.zeros_like(c_sc)
        cp.wait()

    H = h_sc.shape[1]
    tb = gx_ref.shape[0]
    whh = whh_sc[...]                      # (H, 4H), compute dtype

    def step(ts, carry):
        h, c = carry                       # f32 (B, H)
        # Only the h-dependent half of the gate matmul remains per step; the
        # x @ W_ih^T + b part was hoisted into one big tiled matmul (gx).
        gates = (gx_ref[ts].astype(jnp.float32)
                 + jnp.dot(h.astype(whh.dtype), whh,
                           preferred_element_type=jnp.float32))   # (B, 4H)
        # PyTorch gate order i, f, g, o.  (For production H should be a
        # multiple of 128 so these slices are lane-aligned.)
        i = jax.nn.sigmoid(gates[:, 0:H])
        f = jax.nn.sigmoid(gates[:, H:2 * H])
        g = jnp.tanh(gates[:, 2 * H:3 * H])
        o = jax.nn.sigmoid(gates[:, 3 * H:4 * H])
        c_new = f * c + i * g
        h_new = o * jnp.tanh(c_new)
        out_ref[ts] = h_new.astype(out_ref.dtype)
        return (h_new, c_new)

    h_fin, c_fin = jax.lax.fori_loop(0, tb, step, (h_sc[...], c_sc[...]),
                                     unroll=unroll)
    h_sc[...] = h_fin
    c_sc[...] = c_fin


def lstm_recurrence(gx_tbg, w_hh_t, *, block_t=16, out_dtype=None):
    """gx_tbg: (T, B, 4H) precomputed x@W_ih^T + b; w_hh_t: (H, 4H)."""
    T, B, G = gx_tbg.shape
    H = w_hh_t.shape[0]
    out_dtype = out_dtype or gx_tbg.dtype

    # Pad T up to a block_t multiple instead of silently shrinking the block
    # (extra timesteps compute garbage-but-finite values and are sliced off).
    tb = min(block_t, T)
    Tp = _round_up(T, tb)
    if Tp != T:
        gx_tbg = jnp.pad(gx_tbg, ((0, Tp - T), (0, 0), (0, 0)))

    # Bounded unroll once the block is large (code size / vreg pressure).
    unroll = True if tb <= 8 else 4

    gx_bytes = gx_tbg.dtype.itemsize
    vmem_need = (2 * tb * B * G * gx_bytes                      # gx double-buffer
                 + 2 * tb * B * H * jnp.dtype(out_dtype).itemsize
                 + H * G * w_hh_t.dtype.itemsize                # resident W_hh
                 + 2 * B * H * 4)                               # h/c state
    vmem_limit = int(min(max(2 * vmem_need, 32 * 2**20), 64 * 2**20))

    out = pl.pallas_call(
        functools.partial(_lstm_recurrence_kernel, unroll=unroll),
        out_shape=jax.ShapeDtypeStruct((Tp, B, H), out_dtype),
        grid_spec=pltpu.PrefetchScalarGridSpec(
            num_scalar_prefetch=0,
            grid=(Tp // tb,),
            in_specs=[
                pl.BlockSpec((tb, B, G), lambda s: (s, 0, 0)),
                pl.BlockSpec(memory_space=pl.ANY),     # W_hh^T stays in HBM
            ],
            out_specs=pl.BlockSpec((tb, B, H), lambda s: (s, 0, 0)),
            scratch_shapes=[
                pltpu.VMEM((B, H), jnp.float32),        # h state
                pltpu.VMEM((B, H), jnp.float32),        # c state
                pltpu.VMEM((H, G), w_hh_t.dtype),       # resident W_hh (compute dtype)
                pltpu.SemaphoreType.DMA(()),            # weight-load semaphore
            ],
        ),
        compiler_params=pltpu.CompilerParams(
            dimension_semantics=("arbitrary",),
            vmem_limit_bytes=vmem_limit),
    )(gx_tbg, w_hh_t)
    return out[:T] if Tp != T else out


# ------------------------------- Model wrapper --------------------------------
def init_params(key, vocab_size, embedding_dim, hidden_dim, num_layers):
    keys = jax.random.split(key, 3 + 4 * num_layers)
    params = {}
    # nn.Embedding default init: N(0, 1)
    params["embedding"] = jax.random.normal(
        keys[0], (vocab_size, embedding_dim), jnp.float32)
    # nn.LSTM default init: U(-1/sqrt(H), 1/sqrt(H)).  Weights are stored
    # PRE-TRANSPOSED ((in,4H)/(H,4H)) so no per-forward transposes are needed.
    k = 1.0 / math.sqrt(hidden_dim)
    layers = []
    for l in range(num_layers):
        in_dim = embedding_dim if l == 0 else hidden_dim
        kk = keys[1 + 4 * l: 1 + 4 * (l + 1)]
        w_ih = jax.random.uniform(kk[0], (4 * hidden_dim, in_dim),
                                  jnp.float32, -k, k)
        w_hh = jax.random.uniform(kk[1], (4 * hidden_dim, hidden_dim),
                                  jnp.float32, -k, k)
        b_ih = jax.random.uniform(kk[2], (4 * hidden_dim,), jnp.float32, -k, k)
        b_hh = jax.random.uniform(kk[3], (4 * hidden_dim,), jnp.float32, -k, k)
        layers.append(dict(
            w_ih_t=jnp.transpose(w_ih),    # (in_dim, 4H)
            w_hh_t=jnp.transpose(w_hh),    # (H, 4H)
            b=b_ih + b_hh,                 # (4H,)
        ))
    params["lstm"] = layers
    # nn.Linear default init, stored pre-transposed as (H, V).  The vocab dim
    # is padded ONCE here to a 128-multiple when needed, so no per-forward
    # weight padding / logits slicing happens in matmul_bias.
    kf = 1.0 / math.sqrt(hidden_dim)
    fc_w = jax.random.uniform(keys[1 + 4 * num_layers],
                              (vocab_size, hidden_dim), jnp.float32, -kf, kf)
    fc_b = jax.random.uniform(keys[2 + 4 * num_layers],
                              (vocab_size,), jnp.float32, -kf, kf)
    fc_w_t = jnp.transpose(fc_w)                           # (H, V)
    if vocab_size > 128 and vocab_size % 128:
        vp = _round_up(vocab_size, 128)
        fc_w_t = jnp.pad(fc_w_t, ((0, 0), (0, vp - vocab_size)))
        fc_b = jnp.pad(fc_b, ((0, vp - vocab_size),))
    params["fc_w_t"] = fc_w_t
    params["fc_b"] = fc_b
    return params


def language_model_forward(params, x_ids, *, block_t=16):
    """x_ids: (B, T) int32 token ids -> logits (B, T, V)."""
    B, T = x_ids.shape
    V = params["embedding"].shape[0]             # true vocab size (static)
    layers = params["lstm"]
    cdtype = layers[0]["w_hh_t"].dtype            # compute dtype follows params
    H = layers[0]["w_hh_t"].shape[0]

    # Pad batch once to a sublane multiple (>= 8) so h/c state and per-step
    # stores are sublane-dense; padded rows are independent and sliced off.
    Bp = _round_up(B, 8)
    if Bp != B:
        x_ids = jnp.pad(x_ids, ((0, Bp - B), (0, 0)))

    # Embedding gather directly in time-major order (no (B,T,E) transpose).
    h = jnp.take(params["embedding"], jnp.transpose(x_ids), axis=0)  # (T, Bp, E)
    h = h.astype(cdtype)

    for layer in layers:
        Tl, Bl, D = h.shape
        G4 = layer["w_ih_t"].shape[1]             # 4H
        # Hoisted input projection: one big MXU matmul over all timesteps.
        gx = matmul_bias(h.reshape(Tl * Bl, D), layer["w_ih_t"], layer["b"],
                         out_dtype=cdtype)                            # (T*Bp, 4H)
        gx = gx.reshape(Tl, Bl, G4)
        # Sequential part: only h @ W_hh^T + elementwise gates per timestep.
        h = lstm_recurrence(gx, layer["w_hh_t"],
                            block_t=block_t, out_dtype=cdtype)        # (T, Bp, H)

    # Transpose only the small hidden tensor (not the V-wide logits); the fc
    # matmul then emits batch-major logits directly -> no (T,B,V) transpose.
    h_bt = jnp.transpose(h, (1, 0, 2))                                # (Bp, T, H)
    logits = matmul_bias(h_bt.reshape(Bp * T, H), params["fc_w_t"],
                         params["fc_b"], out_dtype=jnp.float32)       # (Bp*T, Vp)
    logits = logits.reshape(Bp, T, -1)
    if logits.shape[-1] != V:
        logits = logits[..., :V]
    if Bp != B:
        logits = logits[:B]
    return logits                                                     # (B, T, V)


# ------------------------------ Pure-JAX reference ----------------------------
def _reference_forward(params, x_ids):
    V = params["embedding"].shape[0]
    emb = jnp.take(params["embedding"].astype(jnp.float32), x_ids, axis=0)
    h_seq = jnp.transpose(emb, (1, 0, 2))                 # (T, B, E)
    for layer in params["lstm"]:
        Hd = layer["w_hh_t"].shape[0]
        Bd = h_seq.shape[1]
        w_ih_t = layer["w_ih_t"].astype(jnp.float32)
        w_hh_t = layer["w_hh_t"].astype(jnp.float32)
        b = layer["b"].astype(jnp.float32)

        def step(carry, x_t, w_ih_t=w_ih_t, w_hh_t=w_hh_t, b=b, Hd=Hd):
            h, c = carry
            gates = x_t @ w_ih_t + h @ w_hh_t + b
            i = jax.nn.sigmoid(gates[:, 0:Hd])
            f = jax.nn.sigmoid(gates[:, Hd:2 * Hd])
            g = jnp.tanh(gates[:, 2 * Hd:3 * Hd])
            o = jax.nn.sigmoid(gates[:, 3 * Hd:4 * Hd])
            c = f * c + i * g
            h = o * jnp.tanh(c)
            return (h, c), h

        init = (jnp.zeros((Bd, Hd), jnp.float32), jnp.zeros((Bd, Hd), jnp.float32))
        _, h_seq = jax.lax.scan(step, init, h_seq)
    out = h_seq @ params["fc_w_t"].astype(jnp.float32) \
        + params["fc_b"].astype(jnp.float32)              # (T, B, Vp)
    out = out[..., :V]
    return jnp.transpose(out, (1, 0, 2))                  # (B, T, V)


if __name__ == "__main__":
    VOCAB, EMB, HID, LAYERS = 64, 32, 32, 2
    B, T = 2, 8

    key = jax.random.PRNGKey(0)
    pkey, xkey = jax.random.split(key)
    params = init_params(pkey, VOCAB, EMB, HID, LAYERS)
    x_ids = jax.random.randint(xkey, (B, T), 0, VOCAB, dtype=jnp.int32)

    fwd = jax.jit(language_model_forward, static_argnames=("block_t",))

    # f32 path (strict numerical check vs pure-JAX reference); block_t=4 forces
    # multiple recurrence grid steps to exercise the h/c state carry.
    out = jax.block_until_ready(fwd(params, x_ids, block_t=4))
    ref = jax.block_until_ready(_reference_forward(params, x_ids))
    assert out.shape == (B, T, VOCAB), out.shape
    assert jnp.allclose(out, ref, atol=2e-4, rtol=2e-4), "mismatch vs reference"

    # bf16 compute path (production config: bf16 weights/activations/resident
    # W_hh, f32 accumulation) -- loose tolerance check vs the f32 reference.
    params_bf16 = jax.tree_util.tree_map(
        lambda a: a.astype(jnp.bfloat16) if a.dtype == jnp.float32 else a, params)
    out_bf16 = jax.block_until_ready(fwd(params_bf16, x_ids))
    assert out_bf16.shape == (B, T, VOCAB)
    assert bool(jnp.all(jnp.isfinite(out_bf16)))
    assert float(jnp.max(jnp.abs(out_bf16.astype(jnp.float32) - ref))) < 0.3, \
        "bf16 path drifted too far from f32 reference"

    print("KERNEL_OK")
</pallas_src>

<mosaic_0001>
module attributes {stable_mosaic.version = 11 : i64} {
  func.func @_lstm_recurrence_kernel(%arg0: i32, %arg1: memref<4x8x128xf32, #tpu.memory_space<vmem>>, %arg2: memref<32x128xf32, #tpu.memory_space<any>>, %arg3: memref<4x8x32xf32, #tpu.memory_space<vmem>>, %arg4: memref<8x32xf32, #tpu.memory_space<vmem>>, %arg5: memref<8x32xf32, #tpu.memory_space<vmem>>, %arg6: memref<32x128xf32, #tpu.memory_space<vmem>>, %arg7: memref<!tpu.dma_semaphore, #tpu.memory_space<semaphore_mem>>) attributes {dimension_semantics = [#tpu.dimension_semantics<arbitrary>], iteration_bounds = array<i64: 2>, scalar_prefetch = 0 : i64, scratch_operands = 4 : i64, tpu.core_type = #tpu.core_type<tc>, window_params = [{transform_indices = @transform_0, window_bounds = array<i64: 4, 8, 128>}, {}, {transform_indices = @transform_2, window_bounds = array<i64: 4, 8, 32>}]} {
    %c0_i32 = arith.constant 0 : i32
    %0 = arith.cmpi eq, %arg0, %c0_i32 : i32
    %1 = arith.extui %0 : i1 to i32
    %c0_i32_0 = arith.constant 0 : i32
    %2 = arith.cmpi ne, %1, %c0_i32_0 : i32
    scf.if %2 {
      tpu.enqueue_dma source(%arg2 : memref<32x128xf32, #tpu.memory_space<any>>) target(%arg6 : memref<32x128xf32, #tpu.memory_space<vmem>>) target_semaphore(%arg7 : memref<!tpu.dma_semaphore, #tpu.memory_space<semaphore_mem>>)
      %cst_42 = arith.constant 0.000000e+00 : f32
      %144 = vector.broadcast %cst_42 : f32 to vector<8x32xf32>
      %c0_43 = arith.constant 0 : index
      %c0_44 = arith.constant 0 : index
      %145 = vector.load %arg4[%c0_43, %c0_44] : memref<8x32xf32, #tpu.memory_space<vmem>>, vector<8x32xf32>
      tpu.vector_store %arg4[%c0_43, %c0_44], %144 {strides = array<i32>} : memref<8x32xf32, #tpu.memory_space<vmem>>, vector<8x32xf32>,
      %cst_45 = arith.constant 0.000000e+00 : f32
      %146 = vector.broadcast %cst_45 : f32 to vector<8x32xf32>
      %c0_46 = arith.constant 0 : index
      %c0_47 = arith.constant 0 : index
      %147 = vector.load %arg5[%c0_46, %c0_47] : memref<8x32xf32, #tpu.memory_space<vmem>>, vector<8x32xf32>
      tpu.vector_store %arg5[%c0_46, %c0_47], %146 {strides = array<i32>} : memref<8x32xf32, #tpu.memory_space<vmem>>, vector<8x32xf32>,
      tpu.wait_dma2 semaphore(%arg7 : memref<!tpu.dma_semaphore, #tpu.memory_space<semaphore_mem>>) src(%arg2 : memref<32x128xf32, #tpu.memory_space<any>>) dst(%arg6 : memref<32x128xf32, #tpu.memory_space<vmem>>)
    } else {
    }
    %c0 = arith.constant 0 : index
    %c0_1 = arith.constant 0 : index
    %3 = vector.load %arg6[%c0, %c0_1] : memref<32x128xf32, #tpu.memory_space<vmem>>, vector<32x128xf32>
    %c0_2 = arith.constant 0 : index
    %c0_3 = arith.constant 0 : index
    %4 = vector.load %arg4[%c0_2, %c0_3] : memref<8x32xf32, #tpu.memory_space<vmem>>, vector<8x32xf32>
    %c0_4 = arith.constant 0 : index
    %c0_5 = arith.constant 0 : index
    %5 = vector.load %arg5[%c0_4, %c0_5] : memref<8x32xf32, #tpu.memory_space<vmem>>, vector<8x32xf32>
    %c0_i32_6 = arith.constant 0 : i32
    %6 = arith.index_cast %c0_i32_6 : i32 to index
    %c0_7 = arith.constant 0 : index
    %c0_8 = arith.constant 0 : index
    %7 = vector.load %arg1[%6, %c0_7, %c0_8] : memref<4x8x128xf32, #tpu.memory_space<vmem>>, vector<1x8x128xf32>
    %8 = vector.shape_cast %7 : vector<1x8x128xf32> to vector<8x128xf32>
    %cst = arith.constant dense<0.000000e+00> : vector<8x128xf32>
    %9 = tpu.matmul %4, %3, %cst {dimension_numbers = #tpu.dot_dimension_numbers<[1], [0], [0], [1], [0, 0, 1, 1], [], []>} : vector<8x32xf32>, vector<32x128xf32>, vector<8x128xf32> -> vector<8x128xf32>
    %10 = arith.addf %8, %9 : vector<8x128xf32>
    %11 = vector.extract_strided_slice %10 {offsets = [0, 0], sizes = [8, 32], strides = [1, 1]} : vector<8x128xf32> to vector<8x32xf32>
    %12 = arith.negf %11 : vector<8x32xf32>
    %13 = math.exp %12 : vector<8x32xf32>
    %cst_9 = arith.constant 1.000000e+00 : f32
    %14 = vector.broadcast %cst_9 : f32 to vector<8x32xf32>
    %15 = arith.addf %14, %13 : vector<8x32xf32>
    %16 = arith.divf %14, %15 : vector<8x32xf32>
    %17 = vector.extract_strided_slice %10 {offsets = [0, 32], sizes = [8, 32], strides = [1, 1]} : vector<8x128xf32> to vector<8x32xf32>
    %18 = arith.negf %17 : vector<8x32xf32>
    %19 = math.exp %18 : vector<8x32xf32>
    %cst_10 = arith.constant 1.000000e+00 : f32
    %20 = vector.broadcast %cst_10 : f32 to vector<8x32xf32>
    %21 = arith.addf %20, %19 : vector<8x32xf32>
    %22 = arith.divf %20, %21 : vector<8x32xf32>
    %23 = vector.extract_strided_slice %10 {offsets = [0, 64], sizes = [8, 32], strides = [1, 1]} : vector<8x128xf32> to vector<8x32xf32>
    %24 = math.tanh %23 : vector<8x32xf32>
    %25 = vector.extract_strided_slice %10 {offsets = [0, 96], sizes = [8, 32], strides = [1, 1]} : vector<8x128xf32> to vector<8x32xf32>
    %26 = arith.negf %25 : vector<8x32xf32>
    %27 = math.exp %26 : vector<8x32xf32>
    %cst_11 = arith.constant 1.000000e+00 : f32
    %28 = vector.broadcast %cst_11 : f32 to vector<8x32xf32>
    %29 = arith.addf %28, %27 : vector<8x32xf32>
    %30 = arith.divf %28, %29 : vector<8x32xf32>
    %31 = arith.mulf %22, %5 : vector<8x32xf32>
    %32 = arith.mulf %16, %24 : vector<8x32xf32>
    %33 = arith.addf %31, %32 : vector<8x32xf32>
    %34 = math.tanh %33 : vector<8x32xf32>
    %35 = arith.mulf %30, %34 : vector<8x32xf32>
    %36 = arith.index_cast %c0_i32_6 : i32 to index
    %c0_12 = arith.constant 0 : index
    %c0_13 = arith.constant 0 : index
    %37 = vector.load %arg3[%36, %c0_12, %c0_13] : memref<4x8x32xf32, #tpu.memory_space<vmem>>, vector<1x8x32xf32>
    %38 = vector.shape_cast %37 : vector<1x8x32xf32> to vector<8x32xf32>
    %39 = vector.shape_cast %35 : vector<8x32xf32> to vector<1x8x32xf32>
    tpu.vector_store %arg3[%36, %c0_12, %c0_13], %39 {strides = array<i32>} : memref<4x8x32xf32, #tpu.memory_space<vmem>>, vector<1x8x32xf32>,
    %c1_i32 = arith.constant 1 : i32
    %40 = arith.index_cast %c1_i32 : i32 to index
    %c0_14 = arith.constant 0 : index
    %c0_15 = arith.constant 0 : index
    %41 = vector.load %arg1[%40, %c0_14, %c0_15] : memref<4x8x128xf32, #tpu.memory_space<vmem>>, vector<1x8x128xf32>
    %42 = vector.shape_cast %41 : vector<1x8x128xf32> to vector<8x128xf32>
    %cst_16 = arith.constant dense<0.000000e+00> : vector<8x128xf32>
    %43 = tpu.matmul %35, %3, %cst_16 {dimension_numbers = #tpu.dot_dimension_numbers<[1], [0], [0], [1], [0, 0, 1, 1], [], []>} : vector<8x32xf32>, vector<32x128xf32>, vector<8x128xf32> -> vector<8x128xf32>
    %44 = arith.addf %42, %43 : vector<8x128xf32>
    %45 = vector.extract_strided_slice %44 {offsets = [0, 0], sizes = [8, 32], strides = [1, 1]} : vector<8x128xf32> to vector<8x32xf32>
    %46 = arith.negf %45 : vector<8x32xf32>
    %47 = math.exp %46 : vector<8x32xf32>
    %cst_17 = arith.constant 1.000000e+00 : f32
    %48 = vector.broadcast %cst_17 : f32 to vector<8x32xf32>
    %49 = arith.addf %48, %47 : vector<8x32xf32>
    %50 = arith.divf %48, %49 : vector<8x32xf32>
    %51 = vector.extract_strided_slice %44 {offsets = [0, 32], sizes = [8, 32], strides = [1, 1]} : vector<8x128xf32> to vector<8x32xf32>
    %52 = arith.negf %51 : vector<8x32xf32>
    %53 = math.exp %52 : vector<8x32xf32>
    %cst_18 = arith.constant 1.000000e+00 : f32
    %54 = vector.broadcast %cst_18 : f32 to vector<8x32xf32>
    %55 = arith.addf %54, %53 : vector<8x32xf32>
    %56 = arith.divf %54, %55 : vector<8x32xf32>
    %57 = vector.extract_strided_slice %44 {offsets = [0, 64], sizes = [8, 32], strides = [1, 1]} : vector<8x128xf32> to vector<8x32xf32>
    %58 = math.tanh %57 : vector<8x32xf32>
    %59 = vector.extract_strided_slice %44 {offsets = [0, 96], sizes = [8, 32], strides = [1, 1]} : vector<8x128xf32> to vector<8x32xf32>
    %60 = arith.negf %59 : vector<8x32xf32>
    %61 = math.exp %60 : vector<8x32xf32>
    %cst_19 = arith.constant 1.000000e+00 : f32
    %62 = vector.broadcast %cst_19 : f32 to vector<8x32xf32>
    %63 = arith.addf %62, %61 : vector<8x32xf32>
    %64 = arith.divf %62, %63 : vector<8x32xf32>
    %65 = arith.mulf %56, %33 : vector<8x32xf32>
    %66 = arith.mulf %50, %58 : vector<8x32xf32>
    %67 = arith.addf %65, %66 : vector<8x32xf32>
    %68 = math.tanh %67 : vector<8x32xf32>
    %69 = arith.mulf %64, %68 : vector<8x32xf32>
    %70 = arith.index_cast %c1_i32 : i32 to index
    %c0_20 = arith.constant 0 : index
    %c0_21 = arith.constant 0 : index
    %71 = vector.load %arg3[%70, %c0_20, %c0_21] : memref<4x8x32xf32, #tpu.memory_space<vmem>>, vector<1x8x32xf32>
    %72 = vector.shape_cast %71 : vector<1x8x32xf32> to vector<8x32xf32>
    %73 = vector.shape_cast %69 : vector<8x32xf32> to vector<1x8x32xf32>
    tpu.vector_store %arg3[%70, %c0_20, %c0_21], %73 {strides = array<i32>} : memref<4x8x32xf32, #tpu.memory_space<vmem>>, vector<1x8x32xf32>,
    %c2_i32 = arith.constant 2 : i32
    %74 = arith.index_cast %c2_i32 : i32 to index
    %c0_22 = arith.constant 0 : index
    %c0_23 = arith.constant 0 : index
    %75 = vector.load %arg1[%74, %c0_22, %c0_23] : memref<4x8x128xf32, #tpu.memory_space<vmem>>, vector<1x8x128xf32>
    %76 = vector.shape_cast %75 : vector<1x8x128xf32> to vector<8x128xf32>
    %cst_24 = arith.constant dense<0.000000e+00> : vector<8x128xf32>
    %77 = tpu.matmul %69, %3, %cst_24 {dimension_numbers = #tpu.dot_dimension_numbers<[1], [0], [0], [1], [0, 0, 1, 1], [], []>} : vector<8x32xf32>, vector<32x128xf32>, vector<8x128xf32> -> vector<8x128xf32>
    %78 = arith.addf %76, %77 : vector<8x128xf32>
    %79 = vector.extract_strided_slice %78 {offsets = [0, 0], sizes = [8, 32], strides = [1, 1]} : vector<8x128xf32> to vector<8x32xf32>
    %80 = arith.negf %79 : vector<8x32xf32>
    %81 = math.exp %80 : vector<8x32xf32>
    %cst_25 = arith.constant 1.000000e+00 : f32
    %82 = vector.broadcast %cst_25 : f32 to vector<8x32xf32>
    %83 = arith.addf %82, %81 : vector<8x32xf32>
    %84 = arith.divf %82, %83 : vector<8x32xf32>
    %85 = vector.extract_strided_slice %78 {offsets = [0, 32], sizes = [8, 32], strides = [1, 1]} : vector<8x128xf32> to vector<8x32xf32>
    %86 = arith.negf %85 : vector<8x32xf32>
    %87 = math.exp %86 : vector<8x32xf32>
    %cst_26 = arith.constant 1.000000e+00 : f32
    %88 = vector.broadcast %cst_26 : f32 to vector<8x32xf32>
    %89 = arith.addf %88, %87 : vector<8x32xf32>
    %90 = arith.divf %88, %89 : vector<8x32xf32>
    %91 = vector.extract_strided_slice %78 {offsets = [0, 64], sizes = [8, 32], strides = [1, 1]} : vector<8x128xf32> to vector<8x32xf32>
    %92 = math.tanh %91 : vector<8x32xf32>
    %93 = vector.extract_strided_slice %78 {offsets = [0, 96], sizes = [8, 32], strides = [1, 1]} : vector<8x128xf32> to vector<8x32xf32>
    %94 = arith.negf %93 : vector<8x32xf32>
    %95 = math.exp %94 : vector<8x32xf32>
    %cst_27 = arith.constant 1.000000e+00 : f32
    %96 = vector.broadcast %cst_27 : f32 to vector<8x32xf32>
    %97 = arith.addf %96, %95 : vector<8x32xf32>
    %98 = arith.divf %96, %97 : vector<8x32xf32>
    %99 = arith.mulf %90, %67 : vector<8x32xf32>
    %100 = arith.mulf %84, %92 : vector<8x32xf32>
    %101 = arith.addf %99, %100 : vector<8x32xf32>
    %102 = math.tanh %101 : vector<8x32xf32>
    %103 = arith.mulf %98, %102 : vector<8x32xf32>
    %104 = arith.index_cast %c2_i32 : i32 to index
    %c0_28 = arith.constant 0 : index
    %c0_29 = arith.constant 0 : index
    %105 = vector.load %arg3[%104, %c0_28, %c0_29] : memref<4x8x32xf32, #tpu.memory_space<vmem>>, vector<1x8x32xf32>
    %106 = vector.shape_cast %105 : vector<1x8x32xf32> to vector<8x32xf32>
    %107 = vector.shape_cast %103 : vector<8x32xf32> to vector<1x8x32xf32>
    tpu.vector_store %arg3[%104, %c0_28, %c0_29], %107 {strides = array<i32>} : memref<4x8x32xf32, #tpu.memory_space<vmem>>, vector<1x8x32xf32>,
    %c3_i32 = arith.constant 3 : i32
    %108 = arith.index_cast %c3_i32 : i32 to index
    %c0_30 = arith.constant 0 : index
    %c0_31 = arith.constant 0 : index
    %109 = vector.load %arg1[%108, %c0_30, %c0_31] : memref<4x8x128xf32, #tpu.memory_space<vmem>>, vector<1x8x128xf32>
    %110 = vector.shape_cast %109 : vector<1x8x128xf32> to vector<8x128xf32>
    %cst_32 = arith.constant dense<0.000000e+00> : vector<8x128xf32>
    %111 = tpu.matmul %103, %3, %cst_32 {dimension_numbers = #tpu.dot_dimension_numbers<[1], [0], [0], [1], [0, 0, 1, 1], [], []>} : vector<8x32xf32>, vector<32x128xf32>, vector<8x128xf32> -> vector<8x128xf32>
    %112 = arith.addf %110, %111 : vector<8x128xf32>
    %113 = vector.extract_strided_slice %112 {offsets = [0, 0], sizes = [8, 32], strides = [1, 1]} : vector<8x128xf32> to vector<8x32xf32>
    %114 = arith.negf %113 : vector<8x32xf32>
    %115 = math.exp %114 : vector<8x32xf32>
    %cst_33 = arith.constant 1.000000e+00 : f32
    %116 = vector.broadcast %cst_33 : f32 to vector<8x32xf32>
    %117 = arith.addf %116, %115 : vector<8x32xf32>
    %118 = arith.divf %116, %117 : vector<8x32xf32>
    %119 = vector.extract_strided_slice %112 {offsets = [0, 32], sizes = [8, 32], strides = [1, 1]} : vector<8x128xf32> to vector<8x32xf32>
    %120 = arith.negf %119 : vector<8x32xf32>
    %121 = math.exp %120 : vector<8x32xf32>
    %cst_34 = arith.constant 1.000000e+00 : f32
    %122 = vector.broadcast %cst_34 : f32 to vector<8x32xf32>
    %123 = arith.addf %122, %121 : vector<8x32xf32>
    %124 = arith.divf %122, %123 : vector<8x32xf32>
    %125 = vector.extract_strided_slice %112 {offsets = [0, 64], sizes = [8, 32], strides = [1, 1]} : vector<8x128xf32> to vector<8x32xf32>
    %126 = math.tanh %125 : vector<8x32xf32>
    %127 = vector.extract_strided_slice %112 {offsets = [0, 96], sizes = [8, 32], strides = [1, 1]} : vector<8x128xf32> to vector<8x32xf32>
    %128 = arith.negf %127 : vector<8x32xf32>
    %129 = math.exp %128 : vector<8x32xf32>
    %cst_35 = arith.constant 1.000000e+00 : f32
    %130 = vector.broadcast %cst_35 : f32 to vector<8x32xf32>
    %131 = arith.addf %130, %129 : vector<8x32xf32>
    %132 = arith.divf %130, %131 : vector<8x32xf32>
    %133 = arith.mulf %124, %101 : vector<8x32xf32>
    %134 = arith.mulf %118, %126 : vector<8x32xf32>
    %135 = arith.addf %133, %134 : vector<8x32xf32>
    %136 = math.tanh %135 : vector<8x32xf32>
    %137 = arith.mulf %132, %136 : vector<8x32xf32>
    %138 = arith.index_cast %c3_i32 : i32 to index
    %c0_36 = arith.constant 0 : index
    %c0_37 = arith.constant 0 : index
    %139 = vector.load %arg3[%138, %c0_36, %c0_37] : memref<4x8x32xf32, #tpu.memory_space<vmem>>, vector<1x8x32xf32>
    %140 = vector.shape_cast %139 : vector<1x8x32xf32> to vector<8x32xf32>
    %141 = vector.shape_cast %137 : vector<8x32xf32> to vector<1x8x32xf32>
    tpu.vector_store %arg3[%138, %c0_36, %c0_37], %141 {strides = array<i32>} : memref<4x8x32xf32, #tpu.memory_space<vmem>>, vector<1x8x32xf32>,
    %c4_i32 = arith.constant 4 : i32
    %c0_38 = arith.constant 0 : index
    %c0_39 = arith.constant 0 : index
    %142 = vector.load %arg4[%c0_38, %c0_39] : memref<8x32xf32, #tpu.memory_space<vmem>>, vector<8x32xf32>
    tpu.vector_store %arg4[%c0_38, %c0_39], %137 {strides = array<i32>} : memref<8x32xf32, #tpu.memory_space<vmem>>, vector<8x32xf32>,
    %c0_40 = arith.constant 0 : index
    %c0_41 = arith.constant 0 : index
    %143 = vector.load %arg5[%c0_40, %c0_41] : memref<8x32xf32, #tpu.memory_space<vmem>>, vector<8x32xf32>
    tpu.vector_store %arg5[%c0_40, %c0_41], %135 {strides = array<i32>} : memref<8x32xf32, #tpu.memory_space<vmem>>, vector<8x32xf32>,
    return
  }
  func.func @transform_0(%arg0: i32) -> (i32, i32, i32) {
    %c0_i32 = arith.constant 0 : i32
    %c0_i32_0 = arith.constant 0 : i32
    %c0_i32_1 = arith.constant 0 : i32
    return %arg0, %c0_i32, %c0_i32_0 : i32, i32, i32
  }
  func.func @transform_2(%arg0: i32) -> (i32, i32, i32) {
    %c0_i32 = arith.constant 0 : i32
    %c0_i32_0 = arith.constant 0 : i32
    %c0_i32_1 = arith.constant 0 : i32
    return %arg0, %c0_i32, %c0_i32_0 : i32, i32, i32
  }
}

module attributes {stable_mosaic.version = 11 : i64} {
  func.func @_matmul_bias_kernel(%arg0: i32, %arg1: i32, %arg2: i32, %arg3: memref<64x32xf32, #tpu.memory_space<vmem>>, %arg4: memref<32x128xf32, #tpu.memory_space<vmem>>, %arg5: memref<1x128xf32, #tpu.memory_space<vmem>>, %arg6: memref<64x128xf32, #tpu.memory_space<vmem>>, %arg7: memref<64x128xf32, #tpu.memory_space<vmem>>) attributes {dimension_semantics = [#tpu.dimension_semantics<parallel>, #tpu.dimension_semantics<parallel>, #tpu.dimension_semantics<arbitrary>], iteration_bounds = array<i64: 1, 1, 1>, scalar_prefetch = 0 : i64, scratch_operands = 1 : i64, tpu.core_type = #tpu.core_type<tc>, window_params = [{transform_indices = @transform_0, window_bounds = array<i64: 64, 32>}, {transform_indices = @transform_1, window_bounds = array<i64: 32, 128>}, {transform_indices = @transform_2, window_bounds = array<i64: 1, 128>}, {transform_indices = @transform_3, window_bounds = array<i64: 64, 128>}]} {
    %c0_i32 = arith.constant 0 : i32
    %0 = arith.cmpi eq, %arg2, %c0_i32 : i32
    %1 = arith.extui %0 : i1 to i32
    %c0_i32_0 = arith.constant 0 : i32
    %2 = arith.cmpi ne, %1, %c0_i32_0 : i32
    scf.if %2 {
      %cst_10 = arith.constant 0.000000e+00 : f32
      %12 = vector.broadcast %cst_10 : f32 to vector<64x128xf32>
      %c0_11 = arith.constant 0 : index
      %c0_12 = arith.constant 0 : index
      %13 = vector.load %arg7[%c0_11, %c0_12] : memref<64x128xf32, #tpu.memory_space<vmem>>, vector<64x128xf32>
      tpu.vector_store %arg7[%c0_11, %c0_12], %12 {strides = array<i32>} : memref<64x128xf32, #tpu.memory_space<vmem>>, vector<64x128xf32>,
    } else {
    }
    %c0 = arith.constant 0 : index
    %c0_1 = arith.constant 0 : index
    %3 = vector.load %arg7[%c0, %c0_1] : memref<64x128xf32, #tpu.memory_space<vmem>>, vector<64x128xf32>
    %c0_2 = arith.constant 0 : index
    %c0_3 = arith.constant 0 : index
    %4 = vector.load %arg3[%c0_2, %c0_3] : memref<64x32xf32, #tpu.memory_space<vmem>>, vector<64x32xf32>
    %c0_4 = arith.constant 0 : index
    %c0_5 = arith.constant 0 : index
    %5 = vector.load %arg4[%c0_4, %c0_5] : memref<32x128xf32, #tpu.memory_space<vmem>>, vector<32x128xf32>
    %cst = arith.constant dense<0.000000e+00> : vector<64x128xf32>
    %6 = tpu.matmul %4, %5, %cst {dimension_numbers = #tpu.dot_dimension_numbers<[1], [0], [0], [1], [0, 0, 1, 1], [], []>} : vector<64x32xf32>, vector<32x128xf32>, vector<64x128xf32> -> vector<64x128xf32>
    %7 = arith.addf %3, %6 : vector<64x128xf32>
    %c0_6 = arith.constant 0 : index
    %c0_7 = arith.constant 0 : index
    %8 = vector.load %arg7[%c0_6, %c0_7] : memref<64x128xf32, #tpu.memory_space<vmem>>, vector<64x128xf32>
    tpu.vector_store %arg7[%c0_6, %c0_7], %7 {strides = array<i32>} : memref<64x128xf32, #tpu.memory_space<vmem>>, vector<64x128xf32>,
    %c0_i32_8 = arith.constant 0 : i32
    %9 = arith.cmpi eq, %arg2, %c0_i32_8 : i32
    %10 = arith.extui %9 : i1 to i32
    %c0_i32_9 = arith.constant 0 : i32
    %11 = arith.cmpi ne, %10, %c0_i32_9 : i32
    scf.if %11 {
      %c0_10 = arith.constant 0 : index
      %c0_11 = arith.constant 0 : index
      %12 = vector.load %arg7[%c0_10, %c0_11] : memref<64x128xf32, #tpu.memory_space<vmem>>, vector<64x128xf32>
      %c0_12 = arith.constant 0 : index
      %c0_13 = arith.constant 0 : index
      %13 = vector.load %arg5[%c0_12, %c0_13] : memref<1x128xf32, #tpu.memory_space<vmem>>, vector<1x128xf32>
      %14 = vector.broadcast %13 : vector<1x128xf32> to vector<64x128xf32>
      %15 = arith.addf %12, %14 : vector<64x128xf32>
      %c0_14 = arith.constant 0 : index
      %c0_15 = arith.constant 0 : index
      %16 = vector.load %arg6[%c0_14, %c0_15] : memref<64x128xf32, #tpu.memory_space<vmem>>, vector<64x128xf32>
      tpu.vector_store %arg6[%c0_14, %c0_15], %15 {strides = array<i32>} : memref<64x128xf32, #tpu.memory_space<vmem>>, vector<64x128xf32>,
    } else {
    }
    return
  }
  func.func @transform_0(%arg0: i32, %arg1: i32, %arg2: i32) -> (i32, i32) {
    %c0_i32 = arith.constant 0 : i32
    return %arg0, %arg2 : i32, i32
  }
  func.func @transform_1(%arg0: i32, %arg1: i32, %arg2: i32) -> (i32, i32) {
    %c0_i32 = arith.constant 0 : i32
    return %arg2, %arg1 : i32, i32
  }
  func.func @transform_2(%arg0: i32, %arg1: i32, %arg2: i32) -> (i32, i32) {
    %c0_i32 = arith.constant 0 : i32
    %c0_i32_0 = arith.constant 0 : i32
    return %c0_i32, %arg1 : i32, i32
  }
  func.func @transform_3(%arg0: i32, %arg1: i32, %arg2: i32) -> (i32, i32) {
    %c0_i32 = arith.constant 0 : i32
    return %arg0, %arg1 : i32, i32
  }
}

module attributes {stable_mosaic.version = 11 : i64} {
  func.func @_matmul_bias_kernel(%arg0: i32, %arg1: i32, %arg2: i32, %arg3: memref<64x32xf32, #tpu.memory_space<vmem>>, %arg4: memref<32x64xf32, #tpu.memory_space<vmem>>, %arg5: memref<1x64xf32, #tpu.memory_space<vmem>>, %arg6: memref<64x64xf32, #tpu.memory_space<vmem>>, %arg7: memref<64x64xf32, #tpu.memory_space<vmem>>) attributes {dimension_semantics = [#tpu.dimension_semantics<parallel>, #tpu.dimension_semantics<parallel>, #tpu.dimension_semantics<arbitrary>], iteration_bounds = array<i64: 1, 1, 1>, scalar_prefetch = 0 : i64, scratch_operands = 1 : i64, tpu.core_type = #tpu.core_type<tc>, window_params = [{transform_indices = @transform_0, window_bounds = array<i64: 64, 32>}, {transform_indices = @transform_1, window_bounds = array<i64: 32, 64>}, {transform_indices = @transform_2, window_bounds = array<i64: 1, 64>}, {transform_indices = @transform_3, window_bounds = array<i64: 64, 64>}]} {
    %c0_i32 = arith.constant 0 : i32
    %0 = arith.cmpi eq, %arg2, %c0_i32 : i32
    %1 = arith.extui %0 : i1 to i32
    %c0_i32_0 = arith.constant 0 : i32
    %2 = arith.cmpi ne, %1, %c0_i32_0 : i32
    scf.if %2 {
      %cst_10 = arith.constant 0.000000e+00 : f32
      %12 = vector.broadcast %cst_10 : f32 to vector<64x64xf32>
      %c0_11 = arith.constant 0 : index
      %c0_12 = arith.constant 0 : index
      %13 = vector.load %arg7[%c0_11, %c0_12] : memref<64x64xf32, #tpu.memory_space<vmem>>, vector<64x64xf32>
      tpu.vector_store %arg7[%c0_11, %c0_12], %12 {strides = array<i32>} : memref<64x64xf32, #tpu.memory_space<vmem>>, vector<64x64xf32>,
    } else {
    }
    %c0 = arith.constant 0 : index
    %c0_1 = arith.constant 0 : index
    %3 = vector.load %arg7[%c0, %c0_1] : memref<64x64xf32, #tpu.memory_space<vmem>>, vector<64x64xf32>
    %c0_2 = arith.constant 0 : index
    %c0_3 = arith.constant 0 : index
    %4 = vector.load %arg3[%c0_2, %c0_3] : memref<64x32xf32, #tpu.memory_space<vmem>>, vector<64x32xf32>
    %c0_4 = arith.constant 0 : index
    %c0_5 = arith.constant 0 : index
    %5 = vector.load %arg4[%c0_4, %c0_5] : memref<32x64xf32, #tpu.memory_space<vmem>>, vector<32x64xf32>
    %cst = arith.constant dense<0.000000e+00> : vector<64x64xf32>
    %6 = tpu.matmul %4, %5, %cst {dimension_numbers = #tpu.dot_dimension_numbers<[1], [0], [0], [1], [0, 0, 1, 1], [], []>} : vector<64x32xf32>, vector<32x64xf32>, vector<64x64xf32> -> vector<64x64xf32>
    %7 = arith.addf %3, %6 : vector<64x64xf32>
    %c0_6 = arith.constant 0 : index
    %c0_7 = arith.constant 0 : index
    %8 = vector.load %arg7[%c0_6, %c0_7] : memref<64x64xf32, #tpu.memory_space<vmem>>, vector<64x64xf32>
    tpu.vector_store %arg7[%c0_6, %c0_7], %7 {strides = array<i32>} : memref<64x64xf32, #tpu.memory_space<vmem>>, vector<64x64xf32>,
    %c0_i32_8 = arith.constant 0 : i32
    %9 = arith.cmpi eq, %arg2, %c0_i32_8 : i32
    %10 = arith.extui %9 : i1 to i32
    %c0_i32_9 = arith.constant 0 : i32
    %11 = arith.cmpi ne, %10, %c0_i32_9 : i32
    scf.if %11 {
      %c0_10 = arith.constant 0 : index
      %c0_11 = arith.constant 0 : index
      %12 = vector.load %arg7[%c0_10, %c0_11] : memref<64x64xf32, #tpu.memory_space<vmem>>, vector<64x64xf32>
      %c0_12 = arith.constant 0 : index
      %c0_13 = arith.constant 0 : index
      %13 = vector.load %arg5[%c0_12, %c0_13] : memref<1x64xf32, #tpu.memory_space<vmem>>, vector<1x64xf32>
      %14 = vector.broadcast %13 : vector<1x64xf32> to vector<64x64xf32>
      %15 = arith.addf %12, %14 : vector<64x64xf32>
      %c0_14 = arith.constant 0 : index
      %c0_15 = arith.constant 0 : index
      %16 = vector.load %arg6[%c0_14, %c0_15] : memref<64x64xf32, #tpu.memory_space<vmem>>, vector<64x64xf32>
      tpu.vector_store %arg6[%c0_14, %c0_15], %15 {strides = array<i32>} : memref<64x64xf32, #tpu.memory_space<vmem>>, vector<64x64xf32>,
    } else {
    }
    return
  }
  func.func @transform_0(%arg0: i32, %arg1: i32, %arg2: i32) -> (i32, i32) {
    %c0_i32 = arith.constant 0 : i32
    return %arg0, %arg2 : i32, i32
  }
  func.func @transform_1(%arg0: i32, %arg1: i32, %arg2: i32) -> (i32, i32) {
    %c0_i32 = arith.constant 0 : i32
    return %arg2, %arg1 : i32, i32
  }
  func.func @transform_2(%arg0: i32, %arg1: i32, %arg2: i32) -> (i32, i32) {
    %c0_i32 = arith.constant 0 : i32
    %c0_i32_0 = arith.constant 0 : i32
    return %c0_i32, %arg1 : i32, i32
  }
  func.func @transform_3(%arg0: i32, %arg1: i32, %arg2: i32) -> (i32, i32) {
    %c0_i32 = arith.constant 0 : i32
    return %arg0, %arg1 : i32, i32
  }
}

</mosaic_0001>

<bundles_post_ra>
// kernel: language_model_forward.9
= control target key start
LH: loop header
LB: loop body
LE: loop exit
PB: predicated region body
PF: predicated region fallthrough
CT: control target
= control target key end

     0   :  { %vm47_vm0 = vcmask 261120   ;;  %vm18_vm1 = vcmask 523264   ;;  %v286_v3 = vmov 0.0   ;;  %s402_s1 = inlined_call_operand.vmem [shape: f32[32,64], index: 1, kind: input, shape index: {}]   ;;  %s403_s0 = inlined_call_operand.vmem [shape: f32[64,32], index: 0, kind: input, shape index: {}]   ;;  %s404_s2 = inlined_call_operand.vmem [shape: f32[1,64], index: 2, kind: input, shape index: {}]   ;;  %s405_s3 = inlined_call_operand.vmem [shape: f32[64,64], index: 3, kind: output, shape index: {}]  }
   0x1   :  { %v43_v0 = vld [vmem:[%s402_s1] sm:$0xff]  ;;  %v44_v1 = vld [vmem:[%s402_s1 + $0x8] sm:$0xff]  ;;  %v45_v2 = vld [vmem:[%s402_s1 + $0x10] sm:$0xff]  ;;  %20 = vst.msk [vmem:[#allocation2 + $0x8] sm:$0xff] %vm18_vm1, %v286_v3 }
   0x2   :  { %19 = vst.msk [vmem:[#allocation2] sm:$0xff] %vm18_vm1, %v286_v3  ;;  %21 = vst.msk [vmem:[#allocation2 + $0x10] sm:$0xff] %vm18_vm1, %v286_v3  ;;  %v273_v4 = vpack.c.bf16 %v44_v1, %v43_v0  ;;  %v46_v5 = vld [vmem:[%s402_s1 + $0x18] sm:$0xff]  ;;  %v35_v6 = vld [vmem:[%s403_s0] sm:$0xff] }
   0x3   :  { %22 = vst.msk [vmem:[#allocation2 + $0x18] sm:$0xff] %vm18_vm1, %v286_v3  ;;  %23 = vst.msk [vmem:[#allocation2 + $0x20] sm:$0xff] %vm18_vm1, %v286_v3  ;;  %v39_v7 = vld [vmem:[%s403_s0 + $0x20] sm:$0xff]  ;;  %v277_v8 = vpack.c.bf16 %v46_v5, %v45_v2  ;;  %261 = vmatprep.mubr.msk.f32.mxu0 %vm47_vm0, %v35_v6  ;;  %v36_v9 = vld [vmem:[%s403_s0 + $0x8] sm:$0xff] }
   0x4   :  { %24 = vst.msk [vmem:[#allocation2 + $0x28] sm:$0xff] %vm18_vm1, %v286_v3  ;;  %25 = vst.msk [vmem:[#allocation2 + $0x30] sm:$0xff] %vm18_vm1, %v286_v3  ;;  %267 = vmatprep.mubr.msk.f32.mxu1 %vm47_vm0, %v39_v7  ;;  %274 = vmatprep.subr.bf16.mxu0 %v273_v4  ;;  %v40_v10 = vld [vmem:[%s403_s0 + $0x28] sm:$0xff]  ;;  %v37_v11 = vld [vmem:[%s403_s0 + $0x10] sm:$0xff] }
   0x5   :  { %26 = vst.msk [vmem:[#allocation2 + $0x38] sm:$0xff] %vm18_vm1, %v286_v3  ;;  %281 = vmatprep.subr.bf16.mxu1 %v273_v4  ;;  %276 = vmatpush3.bf16.msra.mxu0 %v273_v4  ;;  %v41_v12 = vld [vmem:[%s403_s0 + $0x30] sm:$0xff]  ;;  %v38_v13 = vld [vmem:[%s403_s0 + $0x18] sm:$0xff]  ;;  %v240_v39 = vld [vmem:[%s404_s2] ss:$0 sm:$0xff] }
   0x6   :  { %283 = vmatpush3.bf16.msra.mxu1 %v273_v4  ;;  %278 = vmatprep.subr.bf16.mxu0 %v277_v8  ;;  %v42_v14 = vld [vmem:[%s403_s0 + $0x38] sm:$0xff] }
   0x7   :  { %282 = vmatprep.subr.bf16.mxu1 %v277_v8 }
   0x8   :  { %v28_v15 = vld [vmem:[#allocation2 + $0x8] sm:$0xff] }
   0x9   :  { %280 = vmatpush3.bf16.msra.mxu0 %v277_v8  ;;  %v27_v17 = vld [vmem:[#allocation2] sm:$0xff]  ;;  %v29_v29 = vld [vmem:[#allocation2 + $0x10] sm:$0xff] }
   0xa   :  { %284 = vmatpush3.bf16.msra.mxu1 %v277_v8  ;;  %v31_v18 = vld [vmem:[#allocation2 + $0x20] sm:$0xff]  ;;  %v30_v27 = vld [vmem:[#allocation2 + $0x18] sm:$0xff] }
   0xb   :  { %v32_v16 = vld [vmem:[#allocation2 + $0x28] sm:$0xff]  ;;  %v33_v30 = vld [vmem:[#allocation2 + $0x30] sm:$0xff] }
   0xc   :  { %262 = vmatmul.mubr.msk.f32.vlgmr.msra.gmra.mrb[0].mxu0 %vm47_vm0, %v36_v9  ;;  %v34_v28 = vld [vmem:[#allocation2 + $0x38] sm:$0xff] }
   0xd   :  { %268 = vmatmul.mubr.msk.f32.vlgmr.msra.gmra.mrb[0].mxu1 %vm47_vm0, %v40_v10  ;;  %264 = vmatprep.mubr.msk.f32.mxu0 %vm47_vm0, %v37_v11 }
   0xe   :  { %270 = vmatprep.mubr.msk.f32.mxu1 %vm47_vm0, %v41_v12 }
  0x10   :  { %265 = vmatmul.mubr.msk.f32.gmra.mrb[2].mxu0 %vm47_vm0, %v38_v13 }
  0x11   :  { %271 = vmatmul.mubr.msk.f32.gmra.mrb[2].mxu1 %vm47_vm0, %v42_v14 }
  0xdf   :  { %v263_v19 = vpop.f32.mrb[0].mxu0 }
  0xe0   :  { %v269_v20 = vpop.f32.mrb[0].mxu1  ;;  %v178_v21 = vadd.f32 %v263_v19, %v28_v15  ;;  %v138_v23 = vpop.f32.mrb[1].mxu0 }
  0xe1   :  { %v182_v22 = vadd.f32 %v269_v20, %v32_v16  ;;  %v158_v24 = vpop.f32.mrb[1].mxu1  ;;  %v177_v25 = vadd.f32 %v138_v23, %v27_v17 }
  0xe2   :  { %v181_v26 = vadd.f32 %v158_v24, %v31_v18  ;;  %187 = vst.msk [vmem:[#allocation2 + $0x8] sm:$0xff] %vm18_vm1, %v178_v21 }
  0xe3   :  { %191 = vst.msk [vmem:[#allocation2 + $0x28] sm:$0xff] %vm18_vm1, %v182_v22  ;;  %186 = vst.msk [vmem:[#allocation2] sm:$0xff] %vm18_vm1, %v177_v25  ;;  %v266_v31 = vpop.f32.mrb[2].mxu0 }
  0xe4   :  { %190 = vst.msk [vmem:[#allocation2 + $0x20] sm:$0xff] %vm18_vm1, %v181_v26  ;;  %v272_v32 = vpop.f32.mrb[2].mxu1  ;;  %v180_v33 = vadd.f32 %v266_v31, %v30_v27  ;;  %v148_v35 = vpop.f32.mrb[3].mxu0 }
  0xe5   :  { %v184_v34 = vadd.f32 %v272_v32, %v34_v28  ;;  %v168_v36 = vpop.f32.mrb[3].mxu1  ;;  %v179_v37 = vadd.f32 %v148_v35, %v29_v29 }
  0xe6   :  { %v183_v38 = vadd.f32 %v168_v36, %v33_v30  ;;  %189 = vst.msk [vmem:[#allocation2 + $0x18] sm:$0xff] %vm18_vm1, %v180_v33 }
  0xe7   :  { %193 = vst.msk [vmem:[#allocation2 + $0x38] sm:$0xff] %vm18_vm1, %v184_v34  ;;  %188 = vst.msk [vmem:[#allocation2 + $0x10] sm:$0xff] %vm18_vm1, %v179_v37 }
  0xe8   :  { %192 = vst.msk [vmem:[#allocation2 + $0x30] sm:$0xff] %vm18_vm1, %v183_v38 }
  0xe9   :  { %v198_v40 = vld [vmem:[#allocation2 + $0x8] sm:$0xff] }
  0xea   :  { %v202_v41 = vld [vmem:[#allocation2 + $0x28] sm:$0xff]  ;;  %v213_v42 = vadd.f32 %v240_v39, %v198_v40  ;;  %v197_v44 = vld [vmem:[#allocation2] sm:$0xff] }
  0xeb   :  { %v217_v43 = vadd.f32 %v240_v39, %v202_v41  ;;  %v201_v45 = vld [vmem:[#allocation2 + $0x20] sm:$0xff]  ;;  %v212_v46 = vadd.f32 %v240_v39, %v197_v44 }
  0xec   :  { %v216_v47 = vadd.f32 %v240_v39, %v201_v45  ;;  %221 = vst.msk [vmem:[%s405_s3 + $0x8] sm:$0xff] %vm18_vm1, %v213_v42 }
  0xed   :  { %225 = vst.msk [vmem:[%s405_s3 + $0x28] sm:$0xff] %vm18_vm1, %v217_v43  ;;  %220 = vst.msk [vmem:[%s405_s3] sm:$0xff] %vm18_vm1, %v212_v46  ;;  %v200_v48 = vld [vmem:[#allocation2 + $0x18] sm:$0xff] }
  0xee   :  { %224 = vst.msk [vmem:[%s405_s3 + $0x20] sm:$0xff] %vm18_vm1, %v216_v47  ;;  %v204_v49 = vld [vmem:[#allocation2 + $0x38] sm:$0xff]  ;;  %v215_v50 = vadd.f32 %v240_v39, %v200_v48  ;;  %v199_v52 = vld [vmem:[#allocation2 + $0x10] sm:$0xff] }
  0xef   :  { %v219_v51 = vadd.f32 %v240_v39, %v204_v49  ;;  %v203_v53 = vld [vmem:[#allocation2 + $0x30] sm:$0xff]  ;;  %v214_v54 = vadd.f32 %v240_v39, %v199_v52 }
  0xf0   :  { %v218_v55 = vadd.f32 %v240_v39, %v203_v53  ;;  %223 = vst.msk [vmem:[%s405_s3 + $0x18] sm:$0xff] %vm18_vm1, %v215_v50 }
  0xf1   :  { %227 = vst.msk [vmem:[%s405_s3 + $0x38] sm:$0xff] %vm18_vm1, %v219_v51  ;;  %222 = vst.msk [vmem:[%s405_s3 + $0x10] sm:$0xff] %vm18_vm1, %v214_v54 }
  0xf2   :  { %226 = vst.msk [vmem:[%s405_s3 + $0x30] sm:$0xff] %vm18_vm1, %v218_v55 }

// kernel: language_model_forward.5
= control target key start
LH: loop header
LB: loop body
LE: loop exit
PB: predicated region body
PF: predicated region fallthrough
CT: control target
= control target key end

     0   :  { %vm46_vm0 = vcmask 261120   ;;  %s374_s1 = inlined_call_operand.vmem [shape: f32[32,128], index: 1, kind: input, shape index: {}]   ;;  %s375_s0 = inlined_call_operand.vmem [shape: f32[64,32], index: 0, kind: input, shape index: {}]   ;;  %s376_s2 = inlined_call_operand.vmem [shape: f32[1,128], index: 2, kind: input, shape index: {}]   ;;  %s377_s3 = inlined_call_operand.vmem [shape: f32[64,128], index: 3, kind: output, shape index: {}]  }
   0x1   :  { %v42_v0 = vld [vmem:[%s374_s1] sm:$0xff]  ;;  %v43_v1 = vld [vmem:[%s374_s1 + $0x8] sm:$0xff]  ;;  %v44_v2 = vld [vmem:[%s374_s1 + $0x10] sm:$0xff] }
   0x2   :  { %v271_v3 = vpack.c.bf16 %v43_v1, %v42_v0  ;;  %v45_v4 = vld [vmem:[%s374_s1 + $0x18] sm:$0xff]  ;;  %v34_v5 = vld [vmem:[%s375_s0] sm:$0xff]  ;;  %v35_v8 = vld [vmem:[%s375_s0 + $0x8] sm:$0xff] }
   0x3   :  { %v38_v6 = vld [vmem:[%s375_s0 + $0x20] sm:$0xff]  ;;  %v275_v7 = vpack.c.bf16 %v45_v4, %v44_v2  ;;  %259 = vmatprep.mubr.msk.f32.mxu0 %vm46_vm0, %v34_v5  ;;  %v39_v9 = vld [vmem:[%s375_s0 + $0x28] sm:$0xff]  ;;  %v36_v10 = vld [vmem:[%s375_s0 + $0x10] sm:$0xff] }
   0x4   :  { %265 = vmatprep.mubr.msk.f32.mxu1 %vm46_vm0, %v38_v6  ;;  %272 = vmatprep.subr.bf16.mxu0 %v271_v3  ;;  %v40_v11 = vld [vmem:[%s375_s0 + $0x30] sm:$0xff]  ;;  %v37_v12 = vld [vmem:[%s375_s0 + $0x18] sm:$0xff]  ;;  %v238_v14 = vld [vmem:[%s376_s2] ss:$0 sm:$0xff] }
   0x5   :  { %279 = vmatprep.subr.bf16.mxu1 %v271_v3  ;;  %274 = vmatpush3.bf16.msra.mxu0 %v271_v3  ;;  %v41_v13 = vld [vmem:[%s375_s0 + $0x38] sm:$0xff] }
   0x6   :  { %281 = vmatpush3.bf16.msra.mxu1 %v271_v3  ;;  %276 = vmatprep.subr.bf16.mxu0 %v275_v7 }
   0x7   :  { %280 = vmatprep.subr.bf16.mxu1 %v275_v7 }
   0x9   :  { %278 = vmatpush3.bf16.msra.mxu0 %v275_v7 }
   0xa   :  { %282 = vmatpush3.bf16.msra.mxu1 %v275_v7 }
   0xc   :  { %260 = vmatmul.mubr.msk.f32.vlgmr.msra.gmra.mrb[0].mxu0 %vm46_vm0, %v35_v8 }
   0xd   :  { %266 = vmatmul.mubr.msk.f32.vlgmr.msra.gmra.mrb[0].mxu1 %vm46_vm0, %v39_v9  ;;  %262 = vmatprep.mubr.msk.f32.mxu0 %vm46_vm0, %v36_v10 }
   0xe   :  { %268 = vmatprep.mubr.msk.f32.mxu1 %vm46_vm0, %v40_v11 }
  0x10   :  { %263 = vmatmul.mubr.msk.f32.gmra.mrb[2].mxu0 %vm46_vm0, %v37_v12 }
  0x11   :  { %269 = vmatmul.mubr.msk.f32.gmra.mrb[2].mxu1 %vm46_vm0, %v41_v13 }
  0xdf   :  { %v261_v15 = vpop.f32.mrb[0].mxu0 }
  0xe0   :  { %v267_v16 = vpop.f32.mrb[0].mxu1  ;;  %v211_v17 = vadd.f32 %v261_v15, %v238_v14  ;;  %v137_v19 = vpop.f32.mrb[1].mxu0 }
  0xe1   :  { %v215_v18 = vadd.f32 %v267_v16, %v238_v14  ;;  %v157_v20 = vpop.f32.mrb[1].mxu1  ;;  %v210_v21 = vadd.f32 %v238_v14, %v137_v19 }
  0xe2   :  { %v214_v22 = vadd.f32 %v238_v14, %v157_v20  ;;  %219 = vst [vmem:[%s377_s3 + $0x8] sm:$0xff] %v211_v17 }
  0xe3   :  { %223 = vst [vmem:[%s377_s3 + $0x28] sm:$0xff] %v215_v18  ;;  %218 = vst [vmem:[%s377_s3] sm:$0xff] %v210_v21  ;;  %v264_v23 = vpop.f32.mrb[2].mxu0 }
  0xe4   :  { %222 = vst [vmem:[%s377_s3 + $0x20] sm:$0xff] %v214_v22  ;;  %v270_v24 = vpop.f32.mrb[2].mxu1  ;;  %v213_v25 = vadd.f32 %v264_v23, %v238_v14  ;;  %v147_v27 = vpop.f32.mrb[3].mxu0 }
  0xe5   :  { %v217_v26 = vadd.f32 %v270_v24, %v238_v14  ;;  %v167_v28 = vpop.f32.mrb[3].mxu1  ;;  %v212_v29 = vadd.f32 %v238_v14, %v147_v27 }
  0xe6   :  { %v216_v30 = vadd.f32 %v238_v14, %v167_v28  ;;  %221 = vst [vmem:[%s377_s3 + $0x18] sm:$0xff] %v213_v25 }
  0xe7   :  { %225 = vst [vmem:[%s377_s3 + $0x38] sm:$0xff] %v217_v26  ;;  %220 = vst [vmem:[%s377_s3 + $0x10] sm:$0xff] %v212_v29 }
  0xe8   :  { %224 = vst [vmem:[%s377_s3 + $0x30] sm:$0xff] %v216_v30 }

// kernel: language_model_forward.6
= control target key start
LH: loop header
LB: loop body
LE: loop exit
PB: predicated region body
PF: predicated region fallthrough
CT: control target
= control target key end

     0   :  { %s879_s9 = smov 0   ;;  %s951_s0 = inlined_call_operand.vmem [shape: f32[8,8,128], index: 0, kind: input, shape index: {}]   ;;  %s952_s1 = inlined_call_operand.vmem [shape: f32[32,128], index: 1, kind: input, shape index: {}]   ;;  %s953_s2 = inlined_call_operand.vmem [shape: f32[8,8,32], index: 2, kind: output, shape index: {}]  }
   0x1 LB: > { %s685_s10 = sadd.s32 4294967295, %s855_s9   ;;  %p689_p0 = scmp.ge.s32.totalorder %s855_s9, 1  ;;  %s855_s9 = sphi %s879_s9, %s12_s9  }
   0x2   : > { %p89_p1 = scmp.lt.s32.totalorder %s855_s9, 3 }
   0x4   : > { %p90_p2 = pnand %p689_p0, %p89_p1 }
   0x5   : > { %s690_s11 = sshll.u32 (!%p90_p2), %s685_s10, 2  ;;  %p694_p4 = scmp.ne.s32.totalorder (!%p90_p2), %s685_s10, 0 }
   0x6   : > { %93 = sbr.rel (%p90_p2) target bundleno = 2845 (0xb1d), region = 24  ;;  %p110_p3 = scmp.lt.s32.totalorder (!%p90_p2), %s690_s11, 7 }
   0xd   : > { %s955_s11 = smov (!%p110_p3, %s690_s11), 7  ;;  %124 = sbr.rel (%p694_p4) target bundleno = 24 (0x18), region = 28 }
   0xe   : > { %s691_s12 = sshll.u32 %s955_s11, 3  ;;  %v157_v0 = vld [vmem:[%s952_s1] sm:$0xff] (!%p694_p4)  ;;  %v159_v1 = vld [vmem:[%s952_s1 + $0x8] sm:$0xff] (!%p694_p4)  ;;  %v161_v2 = vld [vmem:[%s952_s1 + $0x10] sm:$0xff] (!%p694_p4) }
   0xf   : > { %s890_s15 = scalar_lea.vmem %s951_s0, %s691_s12  ;;  %s895_s18 = scalar_lea.vmem %s953_s2, %s691_s12  ;;  %158 = vst [vmem:[#allocation4] sm:$0xff] (!%p694_p4), %v157_v0  ;;  %160 = vst [vmem:[#allocation4 + $0x8] sm:$0xff] (!%p694_p4), %v159_v1  ;;  %v163_v3 = vld [vmem:[%s952_s1 + $0x18] sm:$0xff] (!%p694_p4) }
  0x10   : > { %162 = vst [vmem:[#allocation4 + $0x10] sm:$0xff] (!%p694_p4), %v161_v2  ;;  %164 = vst [vmem:[#allocation4 + $0x18] sm:$0xff] (!%p694_p4), %v163_v3 }
  0x14   : > { %172 = vsyncadd [#allocation5], 512  ;;  %vm173_vm0 = vcmask 261120   ;;  %v857_v4 = vmov 0.0  }
  0x15   : > { %174 = vst.msk [vmem:[#allocation2] sm:$0xff] %vm173_vm0, %v857_v4  ;;  %175 = vst.msk [vmem:[#allocation3] sm:$0xff] %vm173_vm0, %v857_v4 }
  0x16   : > { %851 = dma.done.wait [#allocation5], 512 }
  0x17   : > { %852 = vsyncadd [#allocation5], 4294966784 }
  0x18 PF: > { %v858_v8 = vmov 0.0|0.0   ;;  %vm859_vm1 = vmmov 0   ;;  %v860_v11 = vmov 0.0   ;;  %vm186_vm2 = vcmask 261120   ;;  %v185_v14 = vld [vmem:[%s890_s15] sm:$0xff]  ;;  %s861_s27 = smov 64  }
  0x19   : > { %776 = vmatprep.subr.bf16.mxu0 %v858_v8  ;;  %740 = vmatprep.mubr.msk.f32.mxu0 %vm859_vm1, %v860_v11  ;;  %s862_s28 = smov 32   ;;  %v697_v34 = vld [vmem:[%s890_s15 + $0x8] sm:$0xff]  ;;  %v701_v52 = vld [vmem:[%s890_s15 + $0x10] sm:$0xff]  ;;  %s863_s29 = smov 96  }
  0x1a   : > { %v179_v5 = vld [vmem:[#allocation4] sm:$0xff]  ;;  %v180_v6 = vld [vmem:[#allocation4 + $0x8] sm:$0xff]  ;;  %782 = vmatprep.subr.bf16.mxu1 %v858_v8  ;;  %751 = vmatprep.mubr.msk.f32.mxu1 %vm859_vm1, %v860_v11 }
  0x1b   : > { %v181_v7 = vld [vmem:[#allocation4 + $0x10] sm:$0xff]  ;;  %v777_v9 = vpack.c.bf16 %v180_v6, %v179_v5  ;;  %v182_v10 = vld [vmem:[#allocation4 + $0x18] sm:$0xff]  ;;  %v705_v6 = vld [vmem:[%s890_s15 + $0x18] sm:$0xff] }
  0x1c   : > { %v780_v12 = vpack.c.bf16 %v182_v10, %v181_v7  ;;  %v183_v13 = vld [vmem:[#allocation2] sm:$0xff]  ;;  %v184_v19 = vld [vmem:[#allocation3] sm:$0xff] }
  0x1d   : > { %778 = vmatpush3.bf16.msra.mxu0 %v777_v9  ;;  %784 = vmatpush3.bf16.msra.mxu1 %v777_v9 }
  0x1e   : > { %779 = vmatprep.subr.bf16.mxu0 %v858_v8  ;;  %785 = vmatprep.subr.bf16.mxu1 %v858_v8 }
  0x21   : > { %781 = vmatpush3.bf16.msra.mxu0 %v780_v12  ;;  %787 = vmatpush3.bf16.msra.mxu1 %v780_v12 }
  0x22   : > { %788 = vmatprep.subr.bf16.mxu0 %v858_v8  ;;  %794 = vmatprep.subr.bf16.mxu1 %v858_v8 }
  0x24   : > { %741 = vmatmul.mubr.msk.f32.vlgmr.msra.gmra.mrb[0].mxu0 %vm186_vm2, %v183_v13 }
  0x25   : > { %790 = vmatpush3.bf16.msra.mxu0 %v777_v9  ;;  %762 = vmatprep.mubr.msk.f32.mxu0 %vm859_vm1, %v860_v11 }
  0x26   : > { %791 = vmatprep.subr.bf16.mxu0 %v858_v8 }
  0x29   : > { %793 = vmatpush3.bf16.msra.mxu0 %v780_v12 }
  0xf7   : > { %v256_v15 = vpop.f32.mrb[0].mxu0 }
  0xf8   : > { %v260_v16 = vadd.f32 %v256_v15, %v185_v14  ;;  %v742_v17 = vpop.f32.mrb[1].mxu0 }
  0xfa   : > { %815 = vtanh.f32 %v260_v16  ;;  %v696_v20 = vmul.f32 -1.442695, %v260_v16 }
  0xfc   : > { %817 = vpow2.f32 %v696_v20 }
 0x104   : > { %v816_v18 = vpop.eup %815 }
 0x105   : > { %274 = vrot.lane.b32.xlu0 %v816_v18, %s861_s27 }
 0x106   : > { %v818_v21 = vpop.eup %817 }
 0x107   : > { %v264_v22 = vadd.f32 1.0, %v818_v21 }
 0x109   : > { %269 = vrot.lane.b32.xlu0 %v184_v19, %s862_s28  ;;  %819 = vrcp.f32 %v264_v22 }
 0x113   : > { %v820_v23 = vpop.eup %819 }
 0x177   : > { %v275_v24 = vpop.permute.xlu0 %274 }
 0x178   : > { %v277_v25 = vmul.f32 %v820_v23, %v275_v24 }
 0x17a   : > { %279 = vrot.lane.b32.xlu1 %v277_v25, %s862_s28 }
 0x17b   : > { %v270_v26 = vpop.permute.xlu0 %269 }
 0x17c   : > { %v272_v27 = vmul.f32 %v820_v23, %v270_v26 }
 0x1ec   : > { %v280_v28 = vpop.permute.xlu1 %279 }
 0x1ed   : > { %v282_v29 = vadd.f32 %v280_v28, %v272_v27 }
 0x1ef   : > { %821 = vtanh.f32 %v282_v29 }
 0x1f9   : > { %v822_v30 = vpop.eup %821 }
 0x1fa   : > { %285 = vrot.lane.b32.xlu1 %v822_v30, %s861_s27 }
 0x26c   : > { %v286_v31 = vpop.permute.xlu1 %285 }
 0x26d   : > { %v288_v32 = vmul.f32 %v820_v23, %v286_v31 }
 0x26f   : > { %290 = vrot.lane.b32.xlu0 %v288_v32, %s862_s28 }
 0x2e1   : > { %v291_v33 = vpop.permute.xlu0 %290 }
 0x2e2   : > { %293 = vst.msk [vmem:[%s895_s18] sm:$0xff] %vm186_vm2, %v291_v33  ;;  %752 = vmatmul.mubr.msk.f32.vlgmr.msra.gmra.mrb[0].mxu1 %vm186_vm2, %v291_v33 }
 0x2e3   : > { %796 = vmatpush3.bf16.msra.mxu1 %v777_v9  ;;  %773 = vmatprep.mubr.msk.f32.mxu1 %vm859_vm1, %v860_v11 }
 0x2e4   : > { %797 = vmatprep.subr.bf16.mxu1 %v858_v8 }
 0x2e7   : > { %799 = vmatpush3.bf16.msra.mxu1 %v780_v12 }
 0x3b5   : > { %v364_v35 = vpop.f32.mrb[0].mxu1 }
 0x3b6   : > { %v368_v36 = vadd.f32 %v697_v34, %v364_v35  ;;  %v753_v37 = vpop.f32.mrb[1].mxu1 }
 0x3b8   : > { %823 = vtanh.f32 %v368_v36  ;;  %v699_v39 = vmul.f32 -1.442695, %v368_v36 }
 0x3ba   : > { %825 = vpow2.f32 %v699_v39 }
 0x3c2   : > { %v824_v38 = vpop.eup %823 }
 0x3c3   : > { %378 = vrot.lane.b32.xlu1 %v824_v38, %s861_s27 }
 0x3c4   : > { %v826_v40 = vpop.eup %825 }
 0x3c5   : > { %v372_v41 = vadd.f32 1.0, %v826_v40 }
 0x3c7   : > { %827 = vrcp.f32 %v372_v41 }
 0x3d1   : > { %v828_v42 = vpop.eup %827 }
 0x3d2   : > { %v376_v45 = vmul.f32 %v828_v42, %v282_v29 }
 0x435   : > { %v379_v43 = vpop.permute.xlu1 %378 }
 0x436   : > { %v381_v44 = vmul.f32 %v828_v42, %v379_v43 }
 0x438   : > { %383 = vrot.lane.b32.xlu0 %v381_v44, %s862_s28 }
 0x4aa   : > { %v384_v46 = vpop.permute.xlu0 %383 }
 0x4ab   : > { %v386_v47 = vadd.f32 %v384_v46, %v376_v45 }
 0x4ad   : > { %829 = vtanh.f32 %v386_v47 }
 0x4b7   : > { %v830_v48 = vpop.eup %829 }
 0x4b8   : > { %389 = vrot.lane.b32.xlu1 %v830_v48, %s861_s27 }
 0x52a   : > { %v390_v49 = vpop.permute.xlu1 %389 }
 0x52b   : > { %v392_v50 = vmul.f32 %v828_v42, %v390_v49 }
 0x52d   : > { %394 = vrot.lane.b32.xlu0 %v392_v50, %s862_s28 }
 0x59f   : > { %v395_v51 = vpop.permute.xlu0 %394 }
 0x5a0   : > { %700 = vst.msk [vmem:[%s895_s18 + $0x8] sm:$0xff] %vm186_vm2, %v395_v51  ;;  %763 = vmatmul.mubr.msk.f32.vlgmr.msra.gmra.mrb[2].mxu0 %vm186_vm2, %v395_v51 }
 0x673   : > { %v469_v53 = vpop.f32.mrb[2].mxu0 }
 0x674   : > { %v473_v54 = vadd.f32 %v701_v52, %v469_v53  ;;  %v764_v55 = vpop.f32.mrb[3].mxu0 }
 0x676   : > { %831 = vtanh.f32 %v473_v54  ;;  %v703_v57 = vmul.f32 -1.442695, %v473_v54 }
 0x678   : > { %833 = vpow2.f32 %v703_v57 }
 0x680   : > { %v832_v56 = vpop.eup %831 }
 0x681   : > { %483 = vrot.lane.b32.xlu1 %v832_v56, %s861_s27 }
 0x682   : > { %v834_v58 = vpop.eup %833 }
 0x683   : > { %v477_v59 = vadd.f32 1.0, %v834_v58 }
 0x685   : > { %835 = vrcp.f32 %v477_v59 }
 0x68f   : > { %v836_v60 = vpop.eup %835 }
 0x690   : > { %v481_v63 = vmul.f32 %v836_v60, %v386_v47 }
 0x6f3   : > { %v484_v61 = vpop.permute.xlu1 %483 }
 0x6f4   : > { %v486_v62 = vmul.f32 %v836_v60, %v484_v61 }
 0x6f6   : > { %488 = vrot.lane.b32.xlu0 %v486_v62, %s862_s28 }
 0x768   : > { %v489_v0 = vpop.permute.xlu0 %488 }
 0x769   : > { %v491_v1 = vadd.f32 %v489_v0, %v481_v63 }
 0x76b   : > { %837 = vtanh.f32 %v491_v1 }
 0x775   : > { %v838_v2 = vpop.eup %837 }
 0x776   : > { %494 = vrot.lane.b32.xlu1 %v838_v2, %s861_s27 }
 0x7e8   : > { %v495_v3 = vpop.permute.xlu1 %494 }
 0x7e9   : > { %v497_v4 = vmul.f32 %v836_v60, %v495_v3 }
 0x7eb   : > { %499 = vrot.lane.b32.xlu0 %v497_v4, %s862_s28 }
 0x85d   : > { %v500_v5 = vpop.permute.xlu0 %499 }
 0x85e   : > { %704 = vst.msk [vmem:[%s895_s18 + $0x10] sm:$0xff] %vm186_vm2, %v500_v5  ;;  %774 = vmatmul.mubr.msk.f32.vlgmr.msra.gmra.mrb[2].mxu1 %vm186_vm2, %v500_v5 }
 0x931   : > { %v574_v7 = vpop.f32.mrb[2].mxu1 }
 0x932   : > { %v578_v8 = vadd.f32 %v705_v6, %v574_v7  ;;  %v775_v9 = vpop.f32.mrb[3].mxu1 }
 0x934   : > { %839 = vtanh.f32 %v578_v8  ;;  %v707_v11 = vmul.f32 -1.442695, %v578_v8 }
 0x936   : > { %841 = vpow2.f32 %v707_v11 }
 0x93e   : > { %v840_v10 = vpop.eup %839 }
 0x93f   : > { %588 = vrot.lane.b32.xlu1 %v840_v10, %s861_s27 }
 0x940   : > { %v842_v12 = vpop.eup %841 }
 0x941   : > { %v582_v13 = vadd.f32 1.0, %v842_v12 }
 0x943   : > { %843 = vrcp.f32 %v582_v13 }
 0x94d   : > { %v844_v14 = vpop.eup %843 }
 0x94e   : > { %v586_v17 = vmul.f32 %v844_v14, %v491_v1 }
 0x9b1   : > { %v589_v15 = vpop.permute.xlu1 %588 }
 0x9b2   : > { %v591_v16 = vmul.f32 %v844_v14, %v589_v15 }
 0x9b4   : > { %593 = vrot.lane.b32.xlu0 %v591_v16, %s862_s28 }
 0xa26   : > { %v594_v18 = vpop.permute.xlu0 %593 }
 0xa27   : > { %v596_v19 = vadd.f32 %v594_v18, %v586_v17 }
 0xa29   : > { %845 = vtanh.f32 %v596_v19 }
 0xa33   : > { %v846_v20 = vpop.eup %845 }
 0xa34   : > { %599 = vrot.lane.b32.xlu1 %v846_v20, %s861_s27 }
 0xa38   : > { %611 = vrot.lane.b32.xlu1 %v596_v19, %s863_s29 }
 0xaa6   : > { %v600_v21 = vpop.permute.xlu1 %599 }
 0xaa7   : > { %v602_v22 = vmul.f32 %v844_v14, %v600_v21 }
 0xaa9   : > { %604 = vrot.lane.b32.xlu0 %v602_v22, %s862_s28 }
 0xaaa   : > { %v612_v23 = vpop.permute.xlu1 %611 }
 0xaab   : > { %614 = vst.msk [vmem:[#allocation3] sm:$0xff] %vm186_vm2, %v612_v23 }
 0xb1b   : > { %v605_v24 = vpop.permute.xlu0 %604 }
 0xb1c   : > { %708 = vst.msk [vmem:[%s895_s18 + $0x18] sm:$0xff] %vm186_vm2, %v605_v24  ;;  %609 = vst.msk [vmem:[#allocation2] sm:$0xff] %vm186_vm2, %v605_v24 }
 0xb1d PF: > { %s12_s9 = sadd.s32 1, %s855_s9  }
 0xb1e   : > { %p9_p5 = scmp.ge.s32.totalorder %s12_s9, 4  }
 0xb20   :  { %11 = sbr.rel (!%p9_p5) target bundleno = 1 (0x1), region = 106 }
 0xb27   :  { %637 = vsyncmov [#allocation5] }
 0xb2a   :  { %s638_s30 = vpop.sfrf %637 }
 0xb2b   :  { %p711_p6 = scmp.ne.s32.totalorder %s638_s30, 0 }
 0xb2d   :  { %642 = shalt.err (%p711_p6)  }

</bundles_post_ra>
